<compile_context>
chip_gen: v6e
topology: v6e:2x2x1
jax: 0.10.0
libtpu: 0.0.40
codegen_flags: <defaults>
</compile_context>

<pallas_src>
import jax
import jax.numpy as jnp
from jax import lax
from jax.experimental import pallas as pl
from jax.experimental.pallas import tpu as pltpu
import numpy as np


# ------------------------------ small helpers -------------------------------

def _round_up(x, m):
    return ((x + m - 1) // m) * m


def _lane_tile(dim, pref):
    """(tile, padded) for a last (lane) dim; `pref` is a multiple of 128."""
    padded = _round_up(dim, 128)
    if padded <= pref:
        return padded, padded
    # Pad up to a multiple of the preferred tile instead of dropping to
    # 128-lane tiles (a ~3x HBM-roofline cliff).
    return pref, _round_up(padded, pref)


def _row_tile(dim, pref):
    """(tile, padded) for a second-to-last (sublane) dim; pref multiple of 8."""
    if dim <= pref:
        return dim, dim                       # full-extent block (always legal)
    return pref, _round_up(dim, pref)


def _vmem_limit(est_bytes):
    # >= the previously-validated 32 MiB, never above 48 MiB (v7x-safe).
    return int(min(48 * 1024 * 1024, max(32 * 1024 * 1024, est_bytes + (4 << 20))))


_VMEM_BUDGET = 40 * 1024 * 1024


# ----------------------------- conv (with_conv) ------------------------------

def _conv_kernel(t_ref, w_ref, b_ref, o_ref, acc_ref):
    # t:   (1, kt, thw)   im2col slab (K x flattened output spatial)
    # w:   (tco, kt)      weight slab
    # b:   (tco, 1)       bias (f32)
    # o:   (1, tco, thw)  output tile (block index constant across k)
    # acc: (tco, thw)     f32 accumulator, resident across the K axis
    k = pl.program_id(3)

    @pl.when(k == 0)
    def _init():
        # Initialise with the broadcast bias -> no zero pass, no bias epilogue.
        acc_ref[...] = jnp.zeros_like(acc_ref) + b_ref[...]

    acc_ref[...] += jnp.dot(w_ref[...], t_ref[0],
                            preferred_element_type=jnp.float32)

    @pl.when(k == pl.num_programs(3) - 1)
    def _store():
        o_ref[0] = acc_ref[...].astype(o_ref.dtype)


def _choose_conv_tiles(K, HW, Co, in_item, out_item):
    """Pick (thw, HWp, tco, Cop, kt, Kp, est_bytes) under the VMEM budget."""
    for thw_pref in (1024, 512, 256, 128):
        thw, HWp = _lane_tile(HW, thw_pref)
        for tco_pref in (512, 256, 128, 64, 32, 16, 8):
            tco, Cop = _row_tile(Co, tco_pref)
            best = None
            for kt in [K] + [k for k in (4096, 2048, 1024, 512, 256, 128) if k < K]:
                Kp = K if kt == K else _round_up(K, kt)
                est = (2 * kt * thw * in_item        # taps (double-buffered)
                       + 2 * tco * kt * in_item      # weights (double-buffered)
                       + tco * thw * 4               # f32 accumulator scratch
                       + 2 * tco * thw * out_item)   # output (double-buffered)
                if est <= _VMEM_BUDGET:
                    key = (Kp, -kt)                  # least K padding, then biggest kt
                    if best is None or key < best[0]:
                        best = (key, (thw, HWp, tco, Cop, kt, Kp, est))
            if best is not None:
                return best[1]
    raise ValueError("no Downsample conv tiling fits the VMEM budget")


def downsample_conv(x, weight, bias, compute_dtype=jnp.bfloat16):
    """Conv2d(Cin, Cout, kernel_size=4, stride=2, padding=1), NCHW in/out."""
    N, Ci, H, W = x.shape
    Co = weight.shape[0]
    KH = KW = 4
    Hout = (H + 2 - KH) // 2 + 1
    Wout = (W + 2 - KW) // 2 + 1
    HW = Hout * Wout
    K = KH * KW * Ci
    out_dtype = x.dtype

    if compute_dtype is not None:            # bf16 operands, f32 accumulation
        x = x.astype(compute_dtype)
        weight = weight.astype(compute_dtype)

    # im2col with the 16 taps folded into the contraction dim: (N, 16*Ci, HW).
    # TODO(synk): a zero-materialisation variant would read 4 (h,w)-parity
    # planes of x via shifted-window index_maps instead of writing this slab
    # to HBM; it needs 2-D spatial tiling so it is left as a follow-up.
    xp = jnp.pad(x, ((0, 0), (0, 0), (1, 1), (1, 1)))
    taps = jnp.stack(
        [xp[:, :, kh:kh + 2 * Hout:2, kw:kw + 2 * Wout:2]
         for kh in range(KH) for kw in range(KW)],
        axis=1,
    ).reshape(N, K, HW)                                   # k = (kh, kw, ci)
    w2 = jnp.transpose(weight, (0, 2, 3, 1)).reshape(Co, K)  # same k ordering

    in_item = jnp.dtype(taps.dtype).itemsize
    out_item = jnp.dtype(out_dtype).itemsize
    thw, HWp, tco, Cop, kt, Kp, est = _choose_conv_tiles(K, HW, Co, in_item, out_item)

    if HWp != HW or Kp != K:
        taps = jnp.pad(taps, ((0, 0), (0, Kp - K), (0, HWp - HW)))
    if Cop != Co or Kp != K:
        w2 = jnp.pad(w2, ((0, Cop - Co), (0, Kp - K)))
    b_arr = bias if Cop == Co else jnp.pad(bias, (0, Cop - Co))
    b_arr = b_arr.reshape(Cop, 1).astype(jnp.float32)

    grid = (N, Cop // tco, HWp // thw, Kp // kt)

    out = pl.pallas_call(
        _conv_kernel,
        out_shape=jax.ShapeDtypeStruct((N, Cop, HWp), out_dtype),
        grid=grid,
        in_specs=[
            pl.BlockSpec((1, kt, thw), lambda n, i, j, k: (n, k, j)),
            pl.BlockSpec((tco, kt), lambda n, i, j, k: (i, k)),
            pl.BlockSpec((tco, 1), lambda n, i, j, k: (i, 0)),
        ],
        out_specs=pl.BlockSpec((1, tco, thw), lambda n, i, j, k: (n, i, j)),
        scratch_shapes=[pltpu.VMEM((tco, thw), jnp.float32)],
        compiler_params=pltpu.CompilerParams(
            dimension_semantics=("parallel", "parallel", "parallel", "arbitrary"),
            vmem_limit_bytes=_vmem_limit(est),
        ),
    )(taps, w2, b_arr)

    if Cop != Co or HWp != HW:
        out = out[:, :Co, :HW]
    return out.reshape(N, Co, Hout, Wout)


# --------------------------- avg-pool (no conv) -------------------------------

def _avgpool_kernel(x_ref, q_ref, o_ref):
    # x: (tr, 2*W) -- each row holds the two input rows of one output row.
    # q: (2*W, Wout) constant pair-average matrix (0.25 at contributing cols).
    # o: (tr, Wout)
    o_ref[...] = jnp.dot(x_ref[...].astype(jnp.float32), q_ref[...],
                         preferred_element_type=jnp.float32).astype(o_ref.dtype)


def downsample_avgpool(x):
    """avg_pool2d(kernel_size=2, stride=2), NCHW in/out."""
    N, C, H, W = x.shape
    Hout, Wout = H // 2, W // 2
    if H % 2:                                # PyTorch floors: drop the last row
        x = x[:, :, :2 * Hout, :]
    R = N * C * Hout
    xr = x.reshape(R, 2 * W)                 # free reshape -> no extra HBM pass

    # Column j of a (2*W)-wide row contributes 0.25 to output column
    # (j % W) // 2; an odd trailing input column maps out of range -> dropped.
    j = jnp.arange(2 * W)
    q = jnp.where(((j % W) // 2)[:, None] == jnp.arange(Wout)[None, :],
                  0.25, 0.0).astype(jnp.float32)

    item = jnp.dtype(x.dtype).itemsize
    lanes = _round_up(2 * W, 128)
    # Row tile sized so the double-buffered input window stays ~<= 12 MiB.
    cap = max(8, (12 * 1024 * 1024) // (2 * lanes * item))
    pref = max(8, min(1024, (cap // 8) * 8))
    tr = R if R <= pref else pref

    est = (2 * tr * lanes * item
           + 2 * _round_up(2 * W, 8) * _round_up(Wout, 128) * 4
           + 2 * tr * _round_up(Wout, 128) * item)

    out = pl.pallas_call(
        _avgpool_kernel,
        out_shape=jax.ShapeDtypeStruct((R, Wout), x.dtype),
        grid=(pl.cdiv(R, tr),),
        in_specs=[
            pl.BlockSpec((tr, 2 * W), lambda i: (i, 0)),
            pl.BlockSpec((2 * W, Wout), lambda i: (0, 0)),   # resident in VMEM
        ],
        out_specs=pl.BlockSpec((tr, Wout), lambda i: (i, 0)),
        compiler_params=pltpu.CompilerParams(
            dimension_semantics=("parallel",),
            vmem_limit_bytes=_vmem_limit(est),
        ),
    )(xr, q)

    return out.reshape(N, C, Hout, Wout)


# --------------------------------- module ------------------------------------

def downsample(x, with_conv, weight=None, bias=None, compute_dtype=jnp.bfloat16):
    if with_conv:
        return downsample_conv(x, weight, bias, compute_dtype=compute_dtype)
    return downsample_avgpool(x)


# --------------------------------- main ---------------------------------------

if __name__ == "__main__":
    key = jax.random.PRNGKey(0)
    k_x, k_w, k_b = jax.random.split(key, 3)

    N, C, H, W = 2, 4, 16, 16
    x = jax.random.normal(k_x, (N, C, H, W), dtype=jnp.float32)

    # Conv2d(C, C, 4, stride=2, padding=1) params (PyTorch default init range).
    fan_in = C * 4 * 4
    bound = 1.0 / np.sqrt(fan_in)
    weight = jax.random.uniform(k_w, (C, C, 4, 4), jnp.float32, -bound, bound)
    bias = jax.random.uniform(k_b, (C,), jnp.float32, -bound, bound)

    ref_conv = lax.conv_general_dilated(
        x, weight, window_strides=(2, 2), padding=((1, 1), (1, 1)),
        dimension_numbers=("NCHW", "OIHW", "NCHW"),
    ) + bias[None, :, None, None]

    # ---- with_conv=True, f32 operands (tight check) ----
    y_f32 = jax.block_until_ready(
        downsample(x, True, weight, bias, compute_dtype=jnp.float32))
    assert y_f32.shape == (N, C, H // 2, W // 2)
    np.testing.assert_allclose(np.asarray(y_f32), np.asarray(ref_conv),
                               rtol=2e-4, atol=2e-4)

    # ---- with_conv=True, default bf16 operands / f32 accumulation ----
    y_bf16 = jax.block_until_ready(downsample(x, True, weight, bias))
    assert y_bf16.shape == (N, C, H // 2, W // 2)
    np.testing.assert_allclose(np.asarray(y_bf16), np.asarray(ref_conv),
                               rtol=5e-2, atol=5e-2)

    # ---- with_conv=False (avg_pool2d k=2, s=2) ----
    y_pool = jax.block_until_ready(downsample(x, False))
    ref_pool = np.asarray(x).reshape(N, C, H // 2, 2, W // 2, 2).mean(axis=(3, 5))
    assert y_pool.shape == (N, C, H // 2, W // 2)
    np.testing.assert_allclose(np.asarray(y_pool), ref_pool, rtol=1e-5, atol=1e-5)

    print("KERNEL_OK")
</pallas_src>

<mosaic_0001>
module attributes {stable_mosaic.version = 11 : i64} {
  func.func @_conv_kernel(%arg0: i32, %arg1: i32, %arg2: i32, %arg3: i32, %arg4: memref<1x64x128xf32, #tpu.memory_space<vmem>>, %arg5: memref<4x64xf32, #tpu.memory_space<vmem>>, %arg6: memref<4x1xf32, #tpu.memory_space<vmem>>, %arg7: memref<1x4x128xf32, #tpu.memory_space<vmem>>, %arg8: memref<4x128xf32, #tpu.memory_space<vmem>>) attributes {dimension_semantics = [#tpu.dimension_semantics<parallel>, #tpu.dimension_semantics<parallel>, #tpu.dimension_semantics<parallel>, #tpu.dimension_semantics<arbitrary>], iteration_bounds = array<i64: 2, 1, 1, 1>, scalar_prefetch = 0 : i64, scratch_operands = 1 : i64, tpu.core_type = #tpu.core_type<tc>, window_params = [{transform_indices = @transform_0, window_bounds = array<i64: 1, 64, 128>}, {transform_indices = @transform_1, window_bounds = array<i64: 4, 64>}, {transform_indices = @transform_2, window_bounds = array<i64: 4, 1>}, {transform_indices = @transform_3, window_bounds = array<i64: 1, 4, 128>}]} {
    %c0_i32 = arith.constant 0 : i32
    %0 = arith.cmpi eq, %arg3, %c0_i32 : i32
    %1 = arith.extui %0 : i1 to i32
    %c0_i32_0 = arith.constant 0 : i32
    %2 = arith.cmpi ne, %1, %c0_i32_0 : i32
    scf.if %2 {
      %cst_11 = arith.constant 0.000000e+00 : f32
      %13 = vector.broadcast %cst_11 : f32 to vector<4x128xf32>
      %c0_12 = arith.constant 0 : index
      %c0_13 = arith.constant 0 : index
      %14 = vector.load %arg6[%c0_12, %c0_13] : memref<4x1xf32, #tpu.memory_space<vmem>>, vector<4x1xf32>
      %15 = vector.broadcast %14 : vector<4x1xf32> to vector<4x128xf32>
      %16 = arith.addf %13, %15 : vector<4x128xf32>
      %c0_14 = arith.constant 0 : index
      %c0_15 = arith.constant 0 : index
      %17 = vector.load %arg8[%c0_14, %c0_15] : memref<4x128xf32, #tpu.memory_space<vmem>>, vector<4x128xf32>
      tpu.vector_store %arg8[%c0_14, %c0_15], %16 {strides = array<i32>} : memref<4x128xf32, #tpu.memory_space<vmem>>, vector<4x128xf32>,
    } else {
    }
    %c0 = arith.constant 0 : index
    %c0_1 = arith.constant 0 : index
    %3 = vector.load %arg8[%c0, %c0_1] : memref<4x128xf32, #tpu.memory_space<vmem>>, vector<4x128xf32>
    %c0_2 = arith.constant 0 : index
    %c0_3 = arith.constant 0 : index
    %4 = vector.load %arg5[%c0_2, %c0_3] : memref<4x64xf32, #tpu.memory_space<vmem>>, vector<4x64xf32>
    %c0_4 = arith.constant 0 : index
    %c0_5 = arith.constant 0 : index
    %c0_6 = arith.constant 0 : index
    %5 = vector.load %arg4[%c0_4, %c0_5, %c0_6] : memref<1x64x128xf32, #tpu.memory_space<vmem>>, vector<1x64x128xf32>
    %6 = vector.shape_cast %5 : vector<1x64x128xf32> to vector<64x128xf32>
    %cst = arith.constant dense<0.000000e+00> : vector<4x128xf32>
    %7 = tpu.matmul %4, %6, %cst {dimension_numbers = #tpu.dot_dimension_numbers<[1], [0], [0], [1], [0, 0, 1, 1], [], []>} : vector<4x64xf32>, vector<64x128xf32>, vector<4x128xf32> -> vector<4x128xf32>
    %8 = arith.addf %3, %7 : vector<4x128xf32>
    %c0_7 = arith.constant 0 : index
    %c0_8 = arith.constant 0 : index
    %9 = vector.load %arg8[%c0_7, %c0_8] : memref<4x128xf32, #tpu.memory_space<vmem>>, vector<4x128xf32>
    tpu.vector_store %arg8[%c0_7, %c0_8], %8 {strides = array<i32>} : memref<4x128xf32, #tpu.memory_space<vmem>>, vector<4x128xf32>,
    %c0_i32_9 = arith.constant 0 : i32
    %10 = arith.cmpi eq, %arg3, %c0_i32_9 : i32
    %11 = arith.extui %10 : i1 to i32
    %c0_i32_10 = arith.constant 0 : i32
    %12 = arith.cmpi ne, %11, %c0_i32_10 : i32
    scf.if %12 {
      %c0_11 = arith.constant 0 : index
      %c0_12 = arith.constant 0 : index
      %13 = vector.load %arg8[%c0_11, %c0_12] : memref<4x128xf32, #tpu.memory_space<vmem>>, vector<4x128xf32>
      %c0_13 = arith.constant 0 : index
      %c0_14 = arith.constant 0 : index
      %c0_15 = arith.constant 0 : index
      %14 = vector.load %arg7[%c0_13, %c0_14, %c0_15] : memref<1x4x128xf32, #tpu.memory_space<vmem>>, vector<1x4x128xf32>
      %15 = vector.shape_cast %14 : vector<1x4x128xf32> to vector<4x128xf32>
      %16 = vector.shape_cast %13 : vector<4x128xf32> to vector<1x4x128xf32>
      tpu.vector_store %arg7[%c0_13, %c0_14, %c0_15], %16 {strides = array<i32>} : memref<1x4x128xf32, #tpu.memory_space<vmem>>, vector<1x4x128xf32>,
    } else {
    }
    return
  }
  func.func @transform_0(%arg0: i32, %arg1: i32, %arg2: i32, %arg3: i32) -> (i32, i32, i32) {
    %c0_i32 = arith.constant 0 : i32
    return %arg0, %arg3, %arg2 : i32, i32, i32
  }
  func.func @transform_1(%arg0: i32, %arg1: i32, %arg2: i32, %arg3: i32) -> (i32, i32) {
    %c0_i32 = arith.constant 0 : i32
    return %arg1, %arg3 : i32, i32
  }
  func.func @transform_2(%arg0: i32, %arg1: i32, %arg2: i32, %arg3: i32) -> (i32, i32) {
    %c0_i32 = arith.constant 0 : i32
    %c0_i32_0 = arith.constant 0 : i32
    return %arg1, %c0_i32 : i32, i32
  }
  func.func @transform_3(%arg0: i32, %arg1: i32, %arg2: i32, %arg3: i32) -> (i32, i32, i32) {
    %c0_i32 = arith.constant 0 : i32
    return %arg0, %arg1, %arg2 : i32, i32, i32
  }
}

</mosaic_0001>

<bundles_post_ra>
// kernel: tpu_custom_call.1
= control target key start
LH: loop header
LB: loop body
LE: loop exit
PB: predicated region body
PF: predicated region fallthrough
CT: control target
= control target key end

     0   :  { %8 = vsyncpa [#allocation4], 0  ;;  %s910_s0 = inlined_call_operand.hbm [shape: f32[2,64,128], index: 0, kind: input, shape index: {}]   ;;  %s911_s1 = inlined_call_operand.vmem [shape: f32[4,64], index: 1, kind: input, shape index: {}]   ;;  %s912_s2 = inlined_call_operand.vmem [shape: f32[4,1], index: 2, kind: input, shape index: {}]   ;;  %s913_s3 = inlined_call_operand.hbm [shape: f32[2,4,128], index: 3, kind: output, shape index: {}]  }
   0x1   :  { %10 = vsyncpa [#allocation4 + $0x1], 0 }
   0x2   :  { %11 = vsyncpa [#allocation5], 0 }
   0x3   :  { %13 = vsyncpa [#allocation5 + $0x1], 0  ;;  %s765_s12 = smov 0   ;;  %s767_s13 = smov 0  }
   0x4   :  { %s769_s14 = smov 0   ;;  %s771_s15 = smov 0  }
   0x5   :  { %s773_s16 = smov 0   ;;  %s775_s17 = smov 0  }
   0x6 LB: > { %s514_s18 = sadd.s32 4294967295, %s736_s17   ;;  %s515_s19 = sadd.s32 4294967294, %s736_s17   ;;  %s736_s17 = sphi %s775_s17, %s19_s17   ;;  %s732_s16 = sphi %s773_s16, %s924_s16   ;;  %s728_s15 = sphi %s771_s15, %s923_s15   ;;  %s724_s14 = sphi %s769_s14, %s922_s14   ;;  %s720_s13 = sphi %s767_s13, %s921_s13   ;;  %s716_s12 = sphi %s765_s12, %s920_s12  }
   0x7   : > { %s45_s20 = sadd.s32 1, %s732_s16  ;;  %s56_s21 = sadd.s32 1, %s724_s14 }
   0x8   : > { %p47_p0 = scmp.ge.s32.totalorder %s45_s20, 2  ;;  %p63_p1 = scmp.ne.s32.totalorder %s724_s14, %s720_s13 }
   0x9   : > { %p64_p2 = scmp.eq.s32.totalorder %s736_s17, 0  ;;  %p69_p3 = scmp.ne.s32.totalorder %s720_s13, %s716_s12 }
   0xa   : > { %s926_s20 = smov (%p47_p0, %s45_s20), 0  ;;  %p70_p5 = scmp.eq.s32.totalorder %s514_s18, 0 }
   0xb   : > { %p806_p4 = por %p64_p2, %p63_p1  ;;  %s49_s23 = ssub.s32 %s732_s16, %s926_s20 }
   0xc   : > { %p151_p6 = scmp.eq.s32.totalorder %s514_s18, 1  ;;  %p54_p7 = scmp.eq.s32.totalorder %s49_s23, 0 }
   0xd   : > { %p812_p8 = por %p70_p5, %p69_p3  ;;  %p157_p10 = scmp.eq.s32.totalorder %s515_s19, 1 }
   0xe   : > { %p816_p9 = por %p151_p6, %p63_p1  ;;  %p572_p13 = scmp.lt.s32.totalorder %s736_s17, 2 }
   0xf   : > { %s821_s26 = scalar_select %p54_p7, %s724_s14, %s56_s21  }
  0x10   : > { %p823_p11 = por %p157_p10, %p69_p3  ;;  %s194_s28 = sand.u32 1, %s724_s14  }
  0x11   : > { %s520_s29 = sshll.u32 %s194_s28, 6  ;;  %s531_s30 = sshll.u32 %s732_s16, 10 }
  0x12   : > { %s207_s6 = scalar_lea.hbm %s910_s0, %s531_s30  ;;  %s198_s7 = scalar_lea.vmem [#allocation3], %s520_s29 }
  0x13   : > { %s208_s8 = sshll.u32 %s198_s7, 4  ;;  %p836_p0 = pnand %p572_p13, %p806_p4  ;;  %s209_s8 = int_to_ptr.vmem [resolvable:$true] %s208_s8 }
  0x14   : > { %p523_p1 = scmp.ge.s32.totalorder %s736_s17, 1  ;;  %s195_s10 = scalar_lea.sflag [#allocation4], %s194_s28 }
  0x15   : > { %p630_p2 = pneg %p836_p0  ;;  %s641_s11 = scalar_lea.vmem %s209_s8, 1024 }
  0x16   : > { %p642_p3 = scmp.ne.s32.totalorder %s209_s8, %s641_s11  ;;  %s738_s18 = smov [#allocation3]  }
  0x17   : > { %s646_s19 = sshll.u32 %s738_s18, 4  ;;  %s647_s19 = int_to_ptr.vmem [resolvable:$false] %s646_s19 }
  0x18   : > { %p644_p5 = pnand %p642_p3, %p630_p2  ;;  %s648_s21 = scalar_lea.vmem %s647_s19, 2048 }
  0x19   : > { %p649_p7 = scmp.lt.s32.totalorder %s209_s8, %s647_s19  ;;  %p650_p10 = scmp.lt.s32.totalorder %s648_s21, %s641_s11 }
  0x1a   : > { %p645_p6 = pneg %p644_p5 }
  0x1b   : > { %p651_p12 = por %p650_p10, %p649_p7 }
  0x1d   : > { %p652_p4 = pnand %p651_p12, %p645_p6 }
  0x1f   : > { %655 = shalt.err (!%p652_p4)
}
  0x20   : > { %s739_s22 = smov 128   ;;  %s740_s23 = smov 8  }
  0x21   : > { %567 = dma.hbm_to_vmem [thread:$0]  (!%p836_p0), %s207_s6, 1024, %s209_s8, %s195_s10, %s739_s22, %s739_s22, %s740_s23  }
  0x22   : > { %p216_p13 = scmp.lt.s32.totalorder %s736_s17, 3 }
  0x24   : > { %p217_p2 = pnand %p523_p1, %p216_p13 }
  0x25   : > { %s849_s28 = sand.u32 (!%p217_p2), 1, %s720_s13  }
  0x26   : > { %220 = sbr.rel (%p217_p2) target bundleno = 277 (0x115), region = 32  ;;  %s524_s29 = sshll.u32 (!%p217_p2), %s849_s28, 6 }
  0x27   : > { %s223_s30 = scalar_lea.sflag (!%p217_p2), [#allocation4], %s849_s28  ;;  %s226_s4 = scalar_lea.vmem (!%p217_p2), [#allocation3], %s524_s29 }
  0x2b   : > { %707 = dma.done.wait (%p812_p8), %s223_s30, 1024  }
  0x2c   : > { %709 = vsyncadd (%p812_p8), %s223_s30, 4294966272  ;;  %v741_v0 = vmov 0.0   ;;  %vm742_vm0 = vmmov 0   ;;  %v743_v1 = vmov 0   ;;  %v293_v2 = vld [vmem:[%s226_s4 + $0x38] sm:$0xff]  ;;  %v292_v3 = vld [vmem:[%s226_s4 + $0x30] sm:$0xff] }
  0x2d   : > { %541 = vmatprep.subr.mxu0 %v741_v0  ;;  %557 = vmatprep.mubr.msk.f32.mxu0 %vm742_vm0, %v741_v0  ;;  %v291_v4 = vld [vmem:[%s226_s4 + $0x28] sm:$0xff]  ;;  %v276_v5 = vld [vmem:[%s912_s2] sm:$0xf]  ;;  %v290_v6 = vld [vmem:[%s226_s4 + $0x20] sm:$0xff]  ;;  %vm294_vm1 = vcmask 523264   ;;  %s525_s8 = sshll.u32 %s849_s28, 2 }
  0x2e   : > { %627 = vset.pattern.permute.xlu0 %v743_v1  ;;  %542 = vmatpush3.msra.mxu0 %v293_v2  ;;  %v289_v7 = vld [vmem:[%s226_s4 + $0x18] sm:$0xff]  ;;  %v288_v8 = vld [vmem:[%s226_s4 + $0x10] sm:$0xff]  ;;  %v287_v9 = vld [vmem:[%s226_s4 + $0x8] sm:$0xff]  ;;  %s528_s9 = sshll.u32 %s728_s15, 6  ;;  %s259_s10 = scalar_lea.vmem [#allocation6], %s525_s8 }
  0x2f   : > { %543 = vmatprep.subr.mxu0 %v741_v0  ;;  %279 = vperm.xlu0 %627, %v276_v5   ;;  %v286_v10 = vld [vmem:[%s226_s4] sm:$0xff]  ;;  %v285_v11 = vld [vmem:[%s911_s1] sm:$0xf]  ;;  %s391_s11 = sshll.u32 %s259_s10, 4  ;;  %s868_s21 = scalar_lea.hbm %s913_s3, %s528_s9  ;;  %s392_s11 = int_to_ptr.vmem [resolvable:$true] %s391_s11 }
  0x30   : > { %544 = vmatpush3.msra.mxu0 %v292_v3  ;;  %s376_s22 = scalar_lea.sflag [#allocation5], %s849_s28  ;;  %s656_s23 = scalar_lea.vmem %s392_s11, 64 }
  0x31   : > { %545 = vmatprep.subr.mxu0 %v741_v0  ;;  %p657_p8 = scmp.ne.s32.totalorder %s392_s11, %s656_s23  ;;  %s744_s29 = smov [#allocation6]  }
  0x32   : > { %546 = vmatpush3.msra.mxu0 %v291_v4  ;;  %s660_s30 = sshll.u32 %s744_s29, 4  ;;  %s661_s30 = int_to_ptr.vmem [resolvable:$false] %s660_s30 }
  0x33   : > { %547 = vmatprep.subr.mxu0 %v741_v0  ;;  %p658_p12 = pnand %p657_p8, %p816_p9  ;;  %s662_s15 = scalar_lea.vmem %s661_s30, 128 }
  0x34   : > { %548 = vmatpush3.msra.mxu0 %v290_v6  ;;  %p663_p1 = scmp.lt.s32.totalorder %s392_s11, %s661_s30  ;;  %p664_p3 = scmp.lt.s32.totalorder %s662_s15, %s656_s23 }
  0x35   : > { %549 = vmatprep.subr.mxu0 %v741_v0  ;;  %p659_p0 = pneg %p658_p12 }
  0x36   : > { %550 = vmatpush3.msra.mxu0 %v289_v7  ;;  %p665_p5 = por %p664_p3, %p663_p1 }
  0x37   : > { %551 = vmatprep.subr.mxu0 %v741_v0 }
  0x38   : > { %552 = vmatpush3.msra.mxu0 %v288_v8  ;;  %p666_p6 = pnand %p665_p5, %p659_p0 }
  0x39   : > { %553 = vmatprep.subr.mxu0 %v741_v0 }
  0x3a   : > { %554 = vmatpush3.msra.mxu0 %v287_v9 }
  0x3b   : > { %555 = vmatprep.subr.mxu0 %v741_v0 }
  0x3c   : > { %556 = vmatpush3.msra.mxu0 %v286_v10 }
  0x3d   : > { %558 = vmatmul.mubr.msk.f32.vlgmr.msra.gmra.mxu0 %vm294_vm1, %v285_v11 }
  0xaa   : > { %v280_v12 = vpop.permute.xlu0 %279 }
  0xab   : > { %283 = vst [vmem:[#allocation2] sm:$0xf] %v280_v12 }
  0xb2   : > { %v284_v13 = vld [vmem:[#allocation2] sm:$0xf] }
  0xfd   : > { %v364_v14 = vpop.f32.mrf.mxu0 }
  0xfe   : > { %v368_v15 = vadd.f32 %v364_v14, %v284_v13 }
  0xff   : > { %v559_v16 = vpop.f32.mrf.mxu0 }
 0x100   : > { %369 = vst [vmem:[#allocation2] sm:$0xf] %v368_v15 }
 0x107   : > { %v373_v17 = vld [vmem:[#allocation2] sm:$0xf] }
 0x108   : > { %374 = vst [vmem:[%s259_s10] sm:$0xf] %v373_v17 }
 0x109   : > { %669 = shalt.err (!%p666_p6)
}
 0x10a   : > { %s670_s4 = scalar_lea.hbm %s868_s21, 64  ;;  %s674_s6 = scalar_lea.hbm %s913_s3, 128 }
 0x10b   : > { %p671_p7 = scmp.ne.s32.totalorder %s868_s21, %s670_s4  ;;  %p675_p13 = scmp.lt.s32.totalorder %s868_s21, %s913_s3 }
 0x10c   : > { %p676_p2 = scmp.lt.s32.totalorder %s674_s6, %s670_s4 }
 0x10d   : > { %p672_p10 = pnand %p671_p7, %p816_p9 }
 0x10e   : > { %p677_p8 = por %p676_p2, %p675_p13 }
 0x10f   : > { %p673_p4 = pneg %p672_p10 }
 0x111   : > { %p678_p12 = pnand %p677_p8, %p673_p4 }
 0x113   : > { %681 = shalt.err (!%p678_p12)
}
 0x114   : > { %562 = dma.vmem_to_hbm [thread:$0]  (%p816_p9), %s392_s11, 64, %s868_s21, %s376_s22  }
 0x115 PF: > { %s403_s8 = sand.u32 1, %s716_s12   ;;  %p919_p0 = scmp.ge.s32.totalorder %s736_s17, 2 }
 0x116   : > { %s404_s9 = scalar_lea.sflag [#allocation5], %s403_s8 }
 0x117   : > { %p569_p1 = pnand %p919_p0, %p823_p11 }
 0x119   : > { %p570_p3 = pneg %p569_p1 }
 0x11b   : > { %711 = dma.done.wait (%p570_p3), %s404_s9, 64  }
 0x11c   : > { %713 = vsyncadd (%p570_p3), %s404_s9, 4294967232  ;;  %s19_s17 = sadd.s32 1, %s736_s17   ;;  %s920_s12 = smov %s720_s13 }
 0x11d   : > { %p16_p5 = scmp.ge.s32.totalorder %s19_s17, 4   ;;  %s921_s13 = smov %s724_s14 }
 0x11e   : > { %s922_s14 = smov %s821_s26  ;;  %s923_s15 = smov %s732_s16 }
 0x11f   : > { %s924_s16 = smov %s926_s20  ;;  %18 = sbr.rel (!%p16_p5) target bundleno = 6 (0x6), region = 91 }
 0x124   :  { %409 = vsyncpa [#allocation4], 1 }
 0x125   :  { %411 = vsyncpa [#allocation4 + $0x1], 1 }
 0x126   :  { %412 = vsyncpa [#allocation5], 1 }
 0x127   :  { %414 = vsyncpa [#allocation5 + $0x1], 1 }

</bundles_post_ra>
